<compile_context>
chip_gen: v7x
topology: tpu7x:2x2x1
jax: 0.10.0
libtpu: 0.0.40
codegen_flags: <defaults>
</compile_context>

<pallas_src>
import functools

import jax
import jax.numpy as jnp
from jax.experimental import pallas as pl
from jax.experimental.pallas import tpu as pltpu


# ----------------------------- helpers -------------------------------------

def _round_up(x, m):
    return ((x + m - 1) // m) * m


def _round_down(x, m):
    return (x // m) * m


def _vmem_params():
    """(per-block budget bytes, vmem_limit_bytes), generation-aware."""
    try:
        vmem_cap = int(pltpu.get_tpu_info().vmem_capacity_bytes)
    except Exception:
        vmem_cap = 64 * 1024 * 1024          # conservative fallback (v7x-sized)
    if vmem_cap >= 96 * 1024 * 1024:          # v5e / v6e: 128 MiB physical VMEM
        return 8 * 1024 * 1024, 64 * 1024 * 1024
    # v7x (64 MiB physical) or unknown: keep headroom (inputs double-buffer,
    # plus f32 upcast temporaries inside the kernel).
    return 6 * 1024 * 1024, 44 * 1024 * 1024


def _choose_tiles(rows, n, itemsize, budget):
    """Pick (row_tile, n_chunk).

    `budget` is the allowed f32-upcast footprint of ONE (row_tile, n_chunk)
    block.  Total VMEM ~= 2 x double-buffered input blocks (input dtype)
    + ~2 x f32 temporaries, which stays well under the vmem_limit chosen in
    `_vmem_params` on every generation.
    """
    sub = max(8, 32 // itemsize)              # sublane packing: f32->8, bf16->16, int8->32
    padded_n = _round_up(n, 128)
    row_bytes_f32 = padded_n * 4              # size off the f32 upcast, not itemsize

    if sub * row_bytes_f32 <= budget:
        # Whole rows fit in one block: single chunk over N (two-pass std).
        row_tile = budget // row_bytes_f32
        n_chunk = None                        # -> full row
    else:
        # Huge H*W: split the reduction axis (Welford combine in the kernel).
        row_tile = 256
        n_chunk = 0                           # decided after row_tile capping

    row_tile = min(row_tile, rows)
    # Leave >=4 row blocks when rows permit (2 per v7x TensorCore x >=2
    # pipeline steps; >=4 pipeline steps on single-TC v5e/v6e so DMA overlaps
    # compute), otherwise >=2 so neither v7x core idles.
    if rows >= 4 * sub:
        row_tile = min(row_tile, _round_up(pl.cdiv(rows, 4), sub))
    elif rows >= 2 * sub:
        row_tile = min(row_tile, _round_up(pl.cdiv(rows, 2), sub))
    if row_tile >= sub:
        row_tile = _round_down(row_tile, sub)
    else:
        row_tile = rows                       # tiny problem: one (partial) block

    if n_chunk is None:
        n_chunk = n
    else:
        n_chunk = max(128, _round_down(budget // (max(row_tile, 1) * 4), 128))
        n_chunk = min(n_chunk, padded_n)
    return int(row_tile), int(n_chunk)


# ----------------------------- kernels -------------------------------------

def _std_single_chunk_kernel(x_ref, o_ref, *, n, inv_nm1):
    """Whole row in one block: two-pass unbiased std over the lane axis."""
    x = x_ref[...].astype(jnp.float32)
    mean = jnp.sum(x, axis=-1, keepdims=True) * (1.0 / n)
    d = x - mean
    var = jnp.sum(d * d, axis=-1, keepdims=True) * inv_nm1
    o_ref[...] = jnp.sqrt(var).astype(o_ref.dtype)


def _std_chunked_kernel(x_ref, o_ref, mean_acc, m2_acc, *,
                        n, n_chunk, last_k, n_last):
    """Reduction axis split over the last grid axis; Chan/Welford combine of
    per-chunk (mean, M2) in VMEM scratch.  Lane masking is emitted only for a
    ragged final chunk (and not at all when n % n_chunk == 0)."""
    k = pl.program_id(1)

    @pl.when(k == 0)
    def _():
        mean_acc[...] = jnp.zeros_like(mean_acc)
        m2_acc[...] = jnp.zeros_like(m2_acc)

    x = x_ref[...].astype(jnp.float32)                    # (TR, n_chunk)

    def _combine(m_b, m2_b, n_b):
        # Chan parallel-variance combine of (mean_acc, m2_acc) with chunk b.
        n_a = (k * n_chunk).astype(jnp.float32)
        n_ab = n_a + n_b
        delta = m_b - mean_acc[...]
        mean_acc[...] = mean_acc[...] + delta * (n_b / n_ab)
        m2_acc[...] = m2_acc[...] + m2_b + (delta * delta) * (n_a * n_b / n_ab)

    def _full_chunk():
        m_b = jnp.sum(x, axis=-1, keepdims=True) * (1.0 / n_chunk)
        d = x - m_b
        _combine(m_b, jnp.sum(d * d, axis=-1, keepdims=True), float(n_chunk))

    if n_last == n_chunk:
        # No ragged tail (trace-time known): never mask.
        _full_chunk()
    else:
        @pl.when(k != last_k)
        def _():
            _full_chunk()

        @pl.when(k == last_k)
        def _():
            # Ragged final chunk: mask the invalid lanes (only here).
            col = jax.lax.broadcasted_iota(jnp.int32, x.shape, dimension=1)
            mask = col < n_last
            xm = jnp.where(mask, x, 0.0)
            m_b = jnp.sum(xm, axis=-1, keepdims=True) * (1.0 / n_last)
            d = jnp.where(mask, x - m_b, 0.0)
            _combine(m_b, jnp.sum(d * d, axis=-1, keepdims=True), float(n_last))

    @pl.when(k == last_k)
    def _():
        var = m2_acc[...] * (1.0 / (n - 1))
        o_ref[...] = jnp.sqrt(var).astype(o_ref.dtype)


# ----------------------------- wrapper --------------------------------------

def std_pool(x, *, _force_tiles=None):
    """x: (B, C, H, W) -> (B, C, 1, 1) std over spatial dims (unbiased)."""
    b, c, h, w = x.shape
    rows = b * c
    n = h * w
    x2d = x.reshape(rows, n)
    itemsize = jnp.dtype(x.dtype).itemsize

    budget, vmem_limit = _vmem_params()

    if _force_tiles is not None:
        row_tile, n_chunk = _force_tiles
        # Validate forced tiles against the (8, 128) block constraint.
        if n_chunk < n and n_chunk % 128 != 0:
            raise ValueError("forced n_chunk must be a multiple of 128 or >= n")
        if row_tile < rows and row_tile % 8 != 0:
            raise ValueError("forced row_tile must be a multiple of 8 or >= rows")
        row_tile = min(row_tile, rows)
    else:
        row_tile, n_chunk = _choose_tiles(rows, n, itemsize, budget)
    grid_rows = pl.cdiv(rows, row_tile)

    # Unbiased std: N == 1 yields NaN by design (matches torch).
    inv_nm1 = (1.0 / (n - 1)) if n > 1 else float("nan")

    if n_chunk >= n:
        out2d = pl.pallas_call(
            functools.partial(_std_single_chunk_kernel, n=n, inv_nm1=inv_nm1),
            out_shape=jax.ShapeDtypeStruct((rows, 1), x.dtype),
            grid_spec=pltpu.PrefetchScalarGridSpec(
                num_scalar_prefetch=0,
                grid=(grid_rows,),
                in_specs=[pl.BlockSpec((row_tile, n), lambda i: (i, 0))],
                out_specs=pl.BlockSpec((row_tile, 1), lambda i: (i, 0)),
            ),
            compiler_params=pltpu.CompilerParams(
                dimension_semantics=("parallel",),
                vmem_limit_bytes=vmem_limit,
            ),
        )(x2d)
    else:
        grid_k = pl.cdiv(n, n_chunk)
        last_k = grid_k - 1
        n_last = n - last_k * n_chunk          # static; == n_chunk if no ragged tail
        out2d = pl.pallas_call(
            functools.partial(_std_chunked_kernel, n=n, n_chunk=n_chunk,
                              last_k=last_k, n_last=n_last),
            out_shape=jax.ShapeDtypeStruct((rows, 1), x.dtype),
            grid_spec=pltpu.PrefetchScalarGridSpec(
                num_scalar_prefetch=0,
                grid=(grid_rows, grid_k),
                in_specs=[pl.BlockSpec((row_tile, n_chunk), lambda i, k: (i, k))],
                out_specs=pl.BlockSpec((row_tile, 1), lambda i, k: (i, 0)),
                scratch_shapes=[pltpu.VMEM((row_tile, 1), jnp.float32),
                                pltpu.VMEM((row_tile, 1), jnp.float32)],
            ),
            compiler_params=pltpu.CompilerParams(
                dimension_semantics=("parallel", "arbitrary"),
                vmem_limit_bytes=vmem_limit,
            ),
        )(x2d)

    return out2d.reshape(b, c, 1, 1)


# ----------------------------- test -----------------------------------------

if __name__ == "__main__":
    key = jax.random.PRNGKey(0)
    k1, k2, k3 = jax.random.split(key, 3)

    # Test 1: module-sized input, auto tiling (single-chunk fast path).
    B, C, H, W = 2, 4, 16, 16
    x = jax.random.normal(k1, (B, C, H, W), dtype=jnp.float32)
    out = jax.block_until_ready(std_pool(x))
    ref = jnp.std(x.reshape(B, C, -1), axis=2, ddof=1).reshape(B, C, 1, 1)
    assert out.shape == (B, C, 1, 1), out.shape
    assert jnp.allclose(out, ref, atol=1e-5, rtol=1e-5), (out, ref)

    # Test 2: force the chunked (Welford) path with a ragged last chunk
    # (n = 144 -> chunks of 128 + 16), exercising the masked-tail branch.
    B2, C2, H2, W2 = 2, 4, 12, 12
    x2 = jax.random.normal(k2, (B2, C2, H2, W2), dtype=jnp.float32)
    out2 = jax.block_until_ready(std_pool(x2, _force_tiles=(8, 128)))
    ref2 = jnp.std(x2.reshape(B2, C2, -1), axis=2, ddof=1).reshape(B2, C2, 1, 1)
    assert jnp.allclose(out2, ref2, atol=1e-5, rtol=1e-5), (out2, ref2)

    # Test 3: chunked path with NO ragged tail (n = 256 -> 2 full 128-chunks),
    # exercising the fully-unmasked trace path.
    x3 = jax.random.normal(k3, (B, C, H, W), dtype=jnp.float32)
    out3 = jax.block_until_ready(std_pool(x3, _force_tiles=(8, 128)))
    ref3 = jnp.std(x3.reshape(B, C, -1), axis=2, ddof=1).reshape(B, C, 1, 1)
    assert jnp.allclose(out3, ref3, atol=1e-5, rtol=1e-5), (out3, ref3)

    print("KERNEL_OK")
</pallas_src>

<mosaic_0001>
module attributes {stable_mosaic.version = 11 : i64} {
  func.func @_std_single_chunk_kernel(%arg0: i32, %arg1: memref<8x256xf32, #tpu.memory_space<vmem>>, %arg2: memref<8x1xf32, #tpu.memory_space<vmem>>) attributes {dimension_semantics = [#tpu.dimension_semantics<parallel>], iteration_bounds = array<i64: 1>, scalar_prefetch = 0 : i64, scratch_operands = 0 : i64, tpu.core_type = #tpu.core_type<tc>, window_params = [{transform_indices = @transform_0, window_bounds = array<i64: 8, 256>}, {transform_indices = @transform_1, window_bounds = array<i64: 8, 1>}]} {
    %c0 = arith.constant 0 : index
    %c0_0 = arith.constant 0 : index
    %0 = vector.load %arg1[%c0, %c0_0] : memref<8x256xf32, #tpu.memory_space<vmem>>, vector<8x256xf32>
    %cst = arith.constant dense<0.000000e+00> : vector<8xf32>
    %1 = vector.multi_reduction <add>, %0, %cst [1] : vector<8x256xf32> to vector<8xf32>
    %2 = vector.shape_cast %1 : vector<8xf32> to vector<8x1xf32>
    %cst_1 = arith.constant 3.906250e-03 : f32
    %3 = vector.broadcast %cst_1 : f32 to vector<8x1xf32>
    %4 = arith.mulf %2, %3 : vector<8x1xf32>
    %5 = vector.broadcast %4 : vector<8x1xf32> to vector<8x256xf32>
    %6 = arith.subf %0, %5 : vector<8x256xf32>
    %7 = arith.mulf %6, %6 : vector<8x256xf32>
    %cst_2 = arith.constant dense<0.000000e+00> : vector<8xf32>
    %8 = vector.multi_reduction <add>, %7, %cst_2 [1] : vector<8x256xf32> to vector<8xf32>
    %9 = vector.shape_cast %8 : vector<8xf32> to vector<8x1xf32>
    %cst_3 = arith.constant 0.00392156886 : f32
    %10 = vector.broadcast %cst_3 : f32 to vector<8x1xf32>
    %11 = arith.mulf %9, %10 : vector<8x1xf32>
    %12 = math.sqrt %11 : vector<8x1xf32>
    %c0_4 = arith.constant 0 : index
    %c0_5 = arith.constant 0 : index
    %13 = vector.load %arg2[%c0_4, %c0_5] : memref<8x1xf32, #tpu.memory_space<vmem>>, vector<8x1xf32>
    tpu.vector_store %arg2[%c0_4, %c0_5], %12 {strides = array<i32>} : memref<8x1xf32, #tpu.memory_space<vmem>>, vector<8x1xf32>,
    return
  }
  func.func @transform_0(%arg0: i32) -> (i32, i32) {
    %c0_i32 = arith.constant 0 : i32
    %c0_i32_0 = arith.constant 0 : i32
    return %arg0, %c0_i32 : i32, i32
  }
  func.func @transform_1(%arg0: i32) -> (i32, i32) {
    %c0_i32 = arith.constant 0 : i32
    %c0_i32_0 = arith.constant 0 : i32
    return %arg0, %c0_i32 : i32, i32
  }
}

</mosaic_0001>

<bundles_post_ra>
// kernel: tpu_custom_call.1
= control target key start
LH: loop header
LB: loop body
LE: loop exit
PB: predicated region body
PF: predicated region fallthrough
CT: control target
= control target key end

     0   :  { %6 = vsyncpa [#allocation3], 0  ;;  %s75_s6 = smov [#allocation2]   ;;  %s101_s0 = inlined_call_operand.hbm [shape: f32[8,256], index: 0, kind: input, shape index: {}]   ;;  %s102_s1 = inlined_call_operand.vmem [shape: f32[8,1], index: 1, kind: output, shape index: {}]  }
   0x1   :  { %s13_s7 = sshll.u32 %s75_s6, 4  ;;  %s51_s10 = scalar_lea.hbm %s101_s0, 256  ;;  %s14_s7 = int_to_ptr.vmem [resolvable:$true] %s13_s7 }
   0x2   :  { %p52_p0 = scmp.ne.s32.totalorder %s101_s0, %s51_s10  ;;  %p55_p1 = scmp.lt.u32.totalorder %s51_s10, %s101_s0 }
   0x4   :  { %p57_p2 = pnand %p55_p1, %p52_p0 }
   0x6   :  { %60 = shalt.err (!%p57_p2)
}
   0x7   :  { %s61_s15 = scalar_lea.vmem %s14_s7, 256  ;;  %p66_p4 = scmp.lt.s32.totalorder %s14_s7, %s14_s7 }
   0x8   :  { %p62_p3 = scmp.ne.s32.totalorder %s14_s7, %s61_s15  ;;  %p67_p5 = scmp.lt.s32.totalorder %s61_s15, %s61_s15 }
   0xa   :  { %p68_p6 = por %p67_p5, %p66_p4 }
   0xc   :  { %p69_p7 = pnand %p68_p6, %p62_p3 }
   0xe   :  { %72 = shalt.err (!%p69_p7)
}
   0xf   :  { %16 = dma.hbm_to_vmem [thread:$0]  %s101_s0, 256, %s14_s7, [#allocation3]  }
  0x10   :  { %73 = dma.done.wait [#allocation3], 256  }
  0x11   :  { %74 = vsyncadd [#allocation3], 4294967040  ;;  %v20_v0 = vld [vmem:[#allocation2] sm:$0xff]  ;;  %v21_v1 = vld [vmem:[#allocation2 + $0x8] sm:$0xff]  ;;  %vm41_vm0 = vcmask 7168  }
  0x12   :  { %v22_v2 = vadd.f32 %v21_v1, %v20_v0 }
  0x14   :  { %23 = vadd.xlane.f32.xlu0 %v22_v2 }
  0xa1   :  { %v24_v3 = vpop.xlane.xlu0 %23 }
  0xa2   :  { %v25_v4 = vmul.f32 0.00390625, %v24_v3 }
  0xa4   :  { %v26_v5 = vsub.f32 %v20_v0, %v25_v4  ;;  %v27_v6 = vsub.f32 %v21_v1, %v25_v4 }
  0xa6   :  { %v28_v7 = vmul.f32 %v26_v5, %v26_v5  ;;  %v29_v8 = vmul.f32 %v27_v6, %v27_v6 }
  0xa8   :  { %v30_v9 = vadd.f32 %v29_v8, %v28_v7 }
  0xaa   :  { %31 = vadd.xlane.f32.xlu0 %v30_v9 }
 0x137   :  { %v32_v10 = vpop.xlane.xlu0 %31 }
 0x138   :  { %v33_v11 = vmul.f32 0.003921569, %v32_v10 }
 0x13a   :  { %49 = vrsqrt.f32 %v33_v11  ;;  %vm36_vm1 = vcmp.eq.f32.partialorder %v33_v11, inf  ;;  %v39_v14 = vand.u32 2147483648, %v33_v11  ;;  %vm38_vm2 = vcmp.eq.f32.partialorder %v33_v11, 0.0 }
 0x144   :  { %v50_v12 = vpop.eup %49 }
 0x145   :  { %v35_v13 = vmul.f32 %v50_v12, %v33_v11 }
 0x147   :  { %v37_v15 = vsel %vm36_vm1, %v33_v11, %v35_v13 }
 0x148   :  { %v40_v16 = vsel %vm38_vm2, %v39_v14, %v37_v15 }
 0x149   :  { %42 = vst.msk [vmem:[%s102_s1] sm:$0xff] %vm41_vm0, %v40_v16 }
 0x14a   :  { %47 = vsyncpa [#allocation3], 1 }

</bundles_post_ra>
